<compile_context>
chip_gen: v6e
topology: v6e:2x2x1
jax: 0.10.0
libtpu: 0.0.40
codegen_flags: <defaults>
</compile_context>

<pallas_src>
import functools

import jax
import jax.numpy as jnp
import numpy as np
from jax.experimental import pallas as pl
from jax.experimental.pallas import tpu as pltpu


# ---------------------------------------------------------------------------
# Pallas kernel: fused pixel-unshuffle + channel-group averaging.
# ---------------------------------------------------------------------------
def _fused_unshuffle_group_mean_kernel(x_ref, m_ref, o_ref, *, i_starts, width,
                                       inv_scale):
    """x_ref: (tbc*Hp, f*W)     rows = (b, c, h'), lanes = i*W + (w'*f + j)
       m_ref: (S, nrs*W, Wp)    constant bf16 selection/averaging matrices
       o_ref: (tbc, S, Hp, Wp)"""
    tbc, slots, hp, wp = o_ref.shape
    nr = m_ref.shape[1]
    for s in range(slots):                       # static unroll, S is tiny
        lo = i_starts[s] * width
        # Only the i-rows contributing to slot s are fed to the MXU, in bf16
        # (no full-tile f32 temp; the cast is a no-op for bf16 inputs).
        xs = x_ref[:, lo:lo + nr].astype(jnp.bfloat16)
        y = jnp.dot(xs, m_ref[s], preferred_element_type=jnp.float32)
        if inv_scale is not None:                # exact f32 scale for non-pow2 G
            y = y * inv_scale
        o_ref[:, s, :, :] = y.reshape(tbc, hp, wp).astype(o_ref.dtype)


def _build_group_matrices(in_channels, out_channels, factor, width, fold_scale):
    """M[s, (i - i_lo[s])*W + w'*f + j, w'] = (1/G or 1) iff (i*f + j) is in
    output slot s.  One MXU pass per slot does the (i, j) de-interleave and
    in-group reduction simultaneously."""
    f = factor
    f2 = f * f
    assert (in_channels * f2) % out_channels == 0
    group = in_channels * f2 // out_channels
    assert f2 % group == 0
    slots = f2 // group
    wp = width // f
    i_lo = [(s * group) // f for s in range(slots)]
    i_hi = [(s * group + group - 1) // f for s in range(slots)]
    nrs = max(hi - lo + 1 for lo, hi in zip(i_lo, i_hi))
    i_lo = [min(lo, f - nrs) for lo in i_lo]     # keep each window in-bounds
    val = (1.0 / group) if fold_scale else 1.0
    m = np.zeros((slots, nrs * width, wp), np.float32)
    for s in range(slots):
        for idx in range(s * group, (s + 1) * group):
            i, j = idx // f, idx % f
            r = i - i_lo[s]
            for w_out in range(wp):
                m[s, r * width + w_out * f + j, w_out] = val
    return jnp.asarray(m, dtype=jnp.bfloat16), tuple(i_lo), nrs


def _choose_tile(bc, hp, f, w, wp, slots, in_item, out_item, sel_bytes):
    """Number of (b, c) units per grid step: a divisor of bc (never ragged),
    sized against a conservative per-step VMEM budget, preferring >= 4 (and
    even, for v7x's 2 TensorCores) grid steps for DMA/compute overlap."""
    in_u = hp * f * w * in_item                  # x rows per (b, c) unit
    out_u = slots * hp * wp * out_item           # output per (b, c) unit
    tmp_u = hp * f * w * 2 + hp * wp * 4         # bf16 MXU feed + f32 dot result
    per_unit = 2 * (in_u + out_u) + tmp_u        # 2x = double-buffered in/out
    budget = 8 * 1024 * 1024 - 2 * sel_bytes     # fits v5e's 16 MiB scoped default
    fit = max(1, budget // max(1, per_unit))

    divs = [d for d in range(1, bc + 1) if bc % d == 0]
    # keep the input block's second-minor dim (tbc*hp) 8-aligned unless full
    ok = [d for d in divs if ((d * hp) % 8 == 0) or d == bc] or divs
    cands = [d for d in ok if d <= fit] or [min(ok)]
    for good in (lambda g: g >= 4 and g % 2 == 0,
                 lambda g: g >= 2 and g % 2 == 0,
                 lambda g: True):
        picks = [d for d in cands if good(bc // d)]
        if picks:
            return max(picks)
    return max(cands)


def _pixel_unshuffle_ref(x, factor):
    """Pure-JAX F.pixel_unshuffle (NCHW) -- used for the fallback + tests."""
    b, c, h, w = x.shape
    f = factor
    x = x.reshape(b, c, h // f, f, w // f, f)
    x = jnp.transpose(x, (0, 1, 3, 5, 2, 4))
    return x.reshape(b, c * f * f, h // f, w // f)


def pixel_unshuffle_channel_averaging_downsample(x, in_channels, out_channels, factor):
    """out[b, o, h', w'] = mean over the o-th group of pixel-unshuffled channels."""
    b, c, h, w = x.shape
    assert c == in_channels
    f = int(factor)
    f2 = f * f
    assert h % f == 0 and w % f == 0
    assert (c * f2) % out_channels == 0
    group = c * f2 // out_channels
    hp, wp = h // f, w // f

    if f2 % group != 0:
        # TODO(synk): groups that straddle input channels (e.g. the factor=1
        # latent-projection config) need a row-mixing kernel; plain JAX here.
        xu = _pixel_unshuffle_ref(x, f)
        return xu.reshape(b, out_channels, group, hp, wp).mean(axis=2)

    slots = f2 // group                          # output channels per input channel
    fold_scale = (group & (group - 1)) == 0      # 1/G exact in bf16 only for pow2 G
    sel, i_starts, _nrs = _build_group_matrices(c, out_channels, f, w, fold_scale)
    inv_scale = None if fold_scale else float(1.0 / group)
    nr = int(sel.shape[1])

    # Free (bitcast) reshape: rows = (b, c, h'), lanes = i*W + (w'*f + j).
    x_rows = x.reshape(b * c * hp, f * w)

    bc = b * c
    tbc = _choose_tile(bc, hp, f, w, wp, slots,
                       x.dtype.itemsize, x.dtype.itemsize,
                       int(sel.size) * sel.dtype.itemsize)
    grid = bc // tbc

    kernel = functools.partial(_fused_unshuffle_group_mean_kernel,
                               i_starts=i_starts, width=w, inv_scale=inv_scale)

    def run(single_buffer_sel):
        sel_kwargs = {}
        if single_buffer_sel and hasattr(pl, "Buffered"):
            # Constant block index -> no re-DMA to hide; one buffer is enough.
            sel_kwargs = dict(pipeline_mode=pl.Buffered(1))
        return pl.pallas_call(
            kernel,
            out_shape=jax.ShapeDtypeStruct((bc, slots, hp, wp), x.dtype),
            grid_spec=pltpu.PrefetchScalarGridSpec(
                num_scalar_prefetch=0,
                grid=(grid,),
                in_specs=[
                    pl.BlockSpec((tbc * hp, f * w), lambda ib: (ib, 0)),
                    pl.BlockSpec((slots, nr, wp), lambda ib: (0, 0, 0),
                                 **sel_kwargs),
                ],
                out_specs=pl.BlockSpec((tbc, slots, hp, wp),
                                       lambda ib: (ib, 0, 0, 0)),
            ),
            compiler_params=pltpu.CompilerParams(
                dimension_semantics=("parallel",)),
        )(x_rows, sel)

    try:
        out2 = run(True)
    except Exception:
        # Older JAX without single-buffer pipeline_mode support.
        out2 = run(False)

    # Flat order of out2 is (b, c, s, h', w') == (b, o, h', w')  ->  free reshape.
    return out2.reshape(b, out_channels, hp, wp)


# ---------------------------------------------------------------------------
# ResidualBlock wrapper (same forward logic as the PyTorch module).
# ---------------------------------------------------------------------------
_ACTIVATIONS = {
    "swish": jax.nn.silu,
    "silu": jax.nn.silu,
    "mish": lambda t: t * jnp.tanh(jax.nn.softplus(t)),
    "gelu": jax.nn.gelu,
    "relu": jax.nn.relu,
}


def get_activation(name):
    name = name.lower()
    if name not in _ACTIVATIONS:
        raise ValueError(f"Unsupported activation function: {name}")
    return _ACTIVATIONS[name]


class ResidualBlock:
    """main / shortcut / pre_norm are arbitrary callables (JAX functions).
    The residual add + post-activation are trivial elementwise ops left to XLA.
    # TODO(synk): fuse add + post_act into the main kernel's epilogue when main
    # is itself a Pallas kernel."""

    def __init__(self, main=None, shortcut=None, post_act=None, pre_norm=None):
        self.pre_norm = pre_norm
        self.main = main
        self.shortcut = shortcut
        self.post_act = get_activation(post_act) if post_act is not None else None

    def forward_main(self, x):
        if self.pre_norm is None:
            return self.main(x)
        return self.main(self.pre_norm(x))

    def __call__(self, x):
        if self.main is None:
            res = x
        elif self.shortcut is None:
            res = self.forward_main(x)
        else:
            res = self.forward_main(x) + self.shortcut(x)
            if self.post_act is not None:
                res = self.post_act(res)
        return res


if __name__ == "__main__":
    in_channels, out_channels, factor = 4, 8, 2
    B, H, W = 2, 16, 16

    key = jax.random.PRNGKey(0)
    x = jax.random.normal(key, (B, in_channels, H, W), dtype=jnp.float32)
    # Snap inputs to the bf16 grid so the f32 correctness check is exact
    # (the kernel feeds the MXU in bf16 by design).
    x = x.astype(jnp.bfloat16).astype(jnp.float32)

    downsample = functools.partial(
        pixel_unshuffle_channel_averaging_downsample,
        in_channels=in_channels, out_channels=out_channels, factor=factor)

    # Pure-JAX reference.
    group = in_channels * factor ** 2 // out_channels
    Hp, Wp = H // factor, W // factor
    xu = _pixel_unshuffle_ref(x, factor)
    ref = xu.reshape(B, out_channels, group, Hp, Wp).mean(axis=2)

    # DC-AE style instantiation: main-only residual block (shortcut=None).
    # At this size the kernel runs a 4-step parallel grid (2 (b,c) units/step).
    block = ResidualBlock(main=downsample, shortcut=None)
    out = jax.block_until_ready(block(x))
    assert out.shape == (B, out_channels, Hp, Wp)
    assert jnp.allclose(out, ref, atol=1e-5, rtol=1e-5)

    # Full residual path: main + shortcut + post activation.
    block2 = ResidualBlock(main=downsample, shortcut=downsample, post_act="relu")
    out2 = jax.block_until_ready(block2(x))
    ref2 = jax.nn.relu(ref + ref)
    assert jnp.allclose(out2, ref2, atol=1e-5, rtol=1e-5)

    # bf16-input path (production dtype): only the final bf16 rounding differs.
    out_bf = jax.block_until_ready(block(x.astype(jnp.bfloat16)))
    assert out_bf.dtype == jnp.bfloat16
    assert jnp.allclose(out_bf.astype(jnp.float32), ref, atol=1e-4, rtol=2e-2)

    print("KERNEL_OK")
</pallas_src>

<mosaic_0001>
module attributes {stable_mosaic.version = 11 : i64} {
  func.func @_fused_unshuffle_group_mean_kernel(%arg0: i32, %arg1: memref<16x32xf32, #tpu.memory_space<vmem>>, %arg2: memref<2x16x8xbf16, #tpu.memory_space<vmem>>, %arg3: memref<2x2x8x8xf32, #tpu.memory_space<vmem>>) attributes {dimension_semantics = [#tpu.dimension_semantics<parallel>], iteration_bounds = array<i64: 4>, scalar_prefetch = 0 : i64, scratch_operands = 0 : i64, tpu.core_type = #tpu.core_type<tc>, window_params = [{transform_indices = @transform_0, window_bounds = array<i64: 16, 32>}, {pipeline_mode = #tpu.pipeline_mode<synchronous>, transform_indices = @transform_1, window_bounds = array<i64: 2, 16, 8>}, {transform_indices = @transform_2, window_bounds = array<i64: 2, 2, 8, 8>}]} {
    %c0 = arith.constant 0 : index
    %c0_0 = arith.constant 0 : index
    %0 = vector.load %arg1[%c0, %c0_0] : memref<16x32xf32, #tpu.memory_space<vmem>>, vector<16x16xf32>
    %1 = arith.truncf %0 : vector<16x16xf32> to vector<16x16xbf16>
    %c0_1 = arith.constant 0 : index
    %c0_2 = arith.constant 0 : index
    %c0_3 = arith.constant 0 : index
    %2 = vector.load %arg2[%c0_1, %c0_2, %c0_3] : memref<2x16x8xbf16, #tpu.memory_space<vmem>>, vector<1x16x8xbf16>
    %3 = vector.shape_cast %2 : vector<1x16x8xbf16> to vector<16x8xbf16>
    %cst = arith.constant dense<0.000000e+00> : vector<16x8xf32>
    %4 = tpu.matmul %1, %3, %cst {dimension_numbers = #tpu.dot_dimension_numbers<[1], [0], [0], [1], [0, 0, 1, 1], [], []>} : vector<16x16xbf16>, vector<16x8xbf16>, vector<16x8xf32> -> vector<16x8xf32>
    %5 = vector.shape_cast %4 : vector<16x8xf32> to vector<2x8x8xf32>
    %c0_4 = arith.constant 0 : index
    %c0_5 = arith.constant 0 : index
    %c0_6 = arith.constant 0 : index
    %c0_7 = arith.constant 0 : index
    %6 = vector.load %arg3[%c0_4, %c0_5, %c0_6, %c0_7] : memref<2x2x8x8xf32, #tpu.memory_space<vmem>>, vector<2x1x8x8xf32>
    %7 = vector.shape_cast %6 : vector<2x1x8x8xf32> to vector<2x8x8xf32>
    %8 = vector.shape_cast %5 : vector<2x8x8xf32> to vector<2x1x8x8xf32>
    tpu.vector_store %arg3[%c0_4, %c0_5, %c0_6, %c0_7], %8 {strides = array<i32>} : memref<2x2x8x8xf32, #tpu.memory_space<vmem>>, vector<2x1x8x8xf32>,
    %c0_8 = arith.constant 0 : index
    %c16 = arith.constant 16 : index
    %9 = vector.load %arg1[%c0_8, %c16] : memref<16x32xf32, #tpu.memory_space<vmem>>, vector<16x16xf32>
    %10 = arith.truncf %9 : vector<16x16xf32> to vector<16x16xbf16>
    %c1 = arith.constant 1 : index
    %c0_9 = arith.constant 0 : index
    %c0_10 = arith.constant 0 : index
    %11 = vector.load %arg2[%c1, %c0_9, %c0_10] : memref<2x16x8xbf16, #tpu.memory_space<vmem>>, vector<1x16x8xbf16>
    %12 = vector.shape_cast %11 : vector<1x16x8xbf16> to vector<16x8xbf16>
    %cst_11 = arith.constant dense<0.000000e+00> : vector<16x8xf32>
    %13 = tpu.matmul %10, %12, %cst_11 {dimension_numbers = #tpu.dot_dimension_numbers<[1], [0], [0], [1], [0, 0, 1, 1], [], []>} : vector<16x16xbf16>, vector<16x8xbf16>, vector<16x8xf32> -> vector<16x8xf32>
    %14 = vector.shape_cast %13 : vector<16x8xf32> to vector<2x8x8xf32>
    %c0_12 = arith.constant 0 : index
    %c1_13 = arith.constant 1 : index
    %c0_14 = arith.constant 0 : index
    %c0_15 = arith.constant 0 : index
    %15 = vector.load %arg3[%c0_12, %c1_13, %c0_14, %c0_15] : memref<2x2x8x8xf32, #tpu.memory_space<vmem>>, vector<2x1x8x8xf32>
    %16 = vector.shape_cast %15 : vector<2x1x8x8xf32> to vector<2x8x8xf32>
    %17 = vector.shape_cast %14 : vector<2x8x8xf32> to vector<2x1x8x8xf32>
    tpu.vector_store %arg3[%c0_12, %c1_13, %c0_14, %c0_15], %17 {strides = array<i32>} : memref<2x2x8x8xf32, #tpu.memory_space<vmem>>, vector<2x1x8x8xf32>,
    return
  }
  func.func @transform_0(%arg0: i32) -> (i32, i32) {
    %c0_i32 = arith.constant 0 : i32
    %c0_i32_0 = arith.constant 0 : i32
    return %arg0, %c0_i32 : i32, i32
  }
  func.func @transform_1(%arg0: i32) -> (i32, i32, i32) {
    %c0_i32 = arith.constant 0 : i32
    %c0_i32_0 = arith.constant 0 : i32
    %c0_i32_1 = arith.constant 0 : i32
    %c0_i32_2 = arith.constant 0 : i32
    return %c0_i32, %c0_i32_0, %c0_i32_1 : i32, i32, i32
  }
  func.func @transform_2(%arg0: i32) -> (i32, i32, i32, i32) {
    %c0_i32 = arith.constant 0 : i32
    %c0_i32_0 = arith.constant 0 : i32
    %c0_i32_1 = arith.constant 0 : i32
    %c0_i32_2 = arith.constant 0 : i32
    return %arg0, %c0_i32, %c0_i32_0, %c0_i32_1 : i32, i32, i32, i32
  }
}

module attributes {stable_mosaic.version = 11 : i64} {
  func.func @_fused_unshuffle_group_mean_kernel(%arg0: i32, %arg1: memref<16x32xf32, #tpu.memory_space<vmem>>, %arg2: memref<2x16x8xbf16, #tpu.memory_space<vmem>>, %arg3: memref<2x2x8x8xf32, #tpu.memory_space<vmem>>) attributes {dimension_semantics = [#tpu.dimension_semantics<parallel>], iteration_bounds = array<i64: 4>, scalar_prefetch = 0 : i64, scratch_operands = 0 : i64, tpu.core_type = #tpu.core_type<tc>, window_params = [{transform_indices = @transform_0, window_bounds = array<i64: 16, 32>}, {pipeline_mode = #tpu.pipeline_mode<synchronous>, transform_indices = @transform_1, window_bounds = array<i64: 2, 16, 8>}, {transform_indices = @transform_2, window_bounds = array<i64: 2, 2, 8, 8>}]} {
    %c0 = arith.constant 0 : index
    %c0_0 = arith.constant 0 : index
    %0 = vector.load %arg1[%c0, %c0_0] : memref<16x32xf32, #tpu.memory_space<vmem>>, vector<16x16xf32>
    %1 = arith.truncf %0 : vector<16x16xf32> to vector<16x16xbf16>
    %c0_1 = arith.constant 0 : index
    %c0_2 = arith.constant 0 : index
    %c0_3 = arith.constant 0 : index
    %2 = vector.load %arg2[%c0_1, %c0_2, %c0_3] : memref<2x16x8xbf16, #tpu.memory_space<vmem>>, vector<1x16x8xbf16>
    %3 = vector.shape_cast %2 : vector<1x16x8xbf16> to vector<16x8xbf16>
    %cst = arith.constant dense<0.000000e+00> : vector<16x8xf32>
    %4 = tpu.matmul %1, %3, %cst {dimension_numbers = #tpu.dot_dimension_numbers<[1], [0], [0], [1], [0, 0, 1, 1], [], []>} : vector<16x16xbf16>, vector<16x8xbf16>, vector<16x8xf32> -> vector<16x8xf32>
    %5 = vector.shape_cast %4 : vector<16x8xf32> to vector<2x8x8xf32>
    %c0_4 = arith.constant 0 : index
    %c0_5 = arith.constant 0 : index
    %c0_6 = arith.constant 0 : index
    %c0_7 = arith.constant 0 : index
    %6 = vector.load %arg3[%c0_4, %c0_5, %c0_6, %c0_7] : memref<2x2x8x8xf32, #tpu.memory_space<vmem>>, vector<2x1x8x8xf32>
    %7 = vector.shape_cast %6 : vector<2x1x8x8xf32> to vector<2x8x8xf32>
    %8 = vector.shape_cast %5 : vector<2x8x8xf32> to vector<2x1x8x8xf32>
    tpu.vector_store %arg3[%c0_4, %c0_5, %c0_6, %c0_7], %8 {strides = array<i32>} : memref<2x2x8x8xf32, #tpu.memory_space<vmem>>, vector<2x1x8x8xf32>,
    %c0_8 = arith.constant 0 : index
    %c16 = arith.constant 16 : index
    %9 = vector.load %arg1[%c0_8, %c16] : memref<16x32xf32, #tpu.memory_space<vmem>>, vector<16x16xf32>
    %10 = arith.truncf %9 : vector<16x16xf32> to vector<16x16xbf16>
    %c1 = arith.constant 1 : index
    %c0_9 = arith.constant 0 : index
    %c0_10 = arith.constant 0 : index
    %11 = vector.load %arg2[%c1, %c0_9, %c0_10] : memref<2x16x8xbf16, #tpu.memory_space<vmem>>, vector<1x16x8xbf16>
    %12 = vector.shape_cast %11 : vector<1x16x8xbf16> to vector<16x8xbf16>
    %cst_11 = arith.constant dense<0.000000e+00> : vector<16x8xf32>
    %13 = tpu.matmul %10, %12, %cst_11 {dimension_numbers = #tpu.dot_dimension_numbers<[1], [0], [0], [1], [0, 0, 1, 1], [], []>} : vector<16x16xbf16>, vector<16x8xbf16>, vector<16x8xf32> -> vector<16x8xf32>
    %14 = vector.shape_cast %13 : vector<16x8xf32> to vector<2x8x8xf32>
    %c0_12 = arith.constant 0 : index
    %c1_13 = arith.constant 1 : index
    %c0_14 = arith.constant 0 : index
    %c0_15 = arith.constant 0 : index
    %15 = vector.load %arg3[%c0_12, %c1_13, %c0_14, %c0_15] : memref<2x2x8x8xf32, #tpu.memory_space<vmem>>, vector<2x1x8x8xf32>
    %16 = vector.shape_cast %15 : vector<2x1x8x8xf32> to vector<2x8x8xf32>
    %17 = vector.shape_cast %14 : vector<2x8x8xf32> to vector<2x1x8x8xf32>
    tpu.vector_store %arg3[%c0_12, %c1_13, %c0_14, %c0_15], %17 {strides = array<i32>} : memref<2x2x8x8xf32, #tpu.memory_space<vmem>>, vector<2x1x8x8xf32>,
    return
  }
  func.func @transform_0(%arg0: i32) -> (i32, i32) {
    %c0_i32 = arith.constant 0 : i32
    %c0_i32_0 = arith.constant 0 : i32
    return %arg0, %c0_i32 : i32, i32
  }
  func.func @transform_1(%arg0: i32) -> (i32, i32, i32) {
    %c0_i32 = arith.constant 0 : i32
    %c0_i32_0 = arith.constant 0 : i32
    %c0_i32_1 = arith.constant 0 : i32
    %c0_i32_2 = arith.constant 0 : i32
    return %c0_i32, %c0_i32_0, %c0_i32_1 : i32, i32, i32
  }
  func.func @transform_2(%arg0: i32) -> (i32, i32, i32, i32) {
    %c0_i32 = arith.constant 0 : i32
    %c0_i32_0 = arith.constant 0 : i32
    %c0_i32_1 = arith.constant 0 : i32
    %c0_i32_2 = arith.constant 0 : i32
    return %arg0, %c0_i32, %c0_i32_0, %c0_i32_1 : i32, i32, i32, i32
  }
}

</mosaic_0001>

<bundles_post_ra>
// kernel: tpu_custom_call.1
= control target key start
LH: loop header
LB: loop body
LE: loop exit
PB: predicated region body
PF: predicated region fallthrough
CT: control target
= control target key end

     0   :  { %7 = vsyncpa [#allocation3], 0  ;;  %s623_s0 = inlined_call_operand.vmem [shape: f32[64,32], index: 0, kind: input, shape index: {}]   ;;  %s624_s1 = inlined_call_operand.vmem [shape: bf16[2,16,8], index: 1, kind: input, shape index: {}]   ;;  %s625_s2 = inlined_call_operand.hbm [shape: f32[8,2,8,8], index: 2, kind: output, shape index: {}]  }
   0x1   :  { %9 = vsyncpa [#allocation3 + $0x1], 0  ;;  %s512_s9 = smov 0   ;;  %s514_s10 = smov 0  }
   0x2   :  { %s516_s11 = smov 0   ;;  %s518_s12 = smov 0  }
   0x3 LB: > { %s533_s13 = sadd.s32 4294967295, %s489_s12   ;;  %s344_s14 = sadd.s32 4294967294, %s489_s12   ;;  %s489_s12 = sphi %s518_s12, %s631_s12   ;;  %s485_s11 = sphi %s516_s11, %s630_s11   ;;  %s481_s10 = sphi %s514_s10, %s629_s10   ;;  %s477_s9 = sphi %s512_s9, %s628_s9  }
   0x4   : > { %s537_s15 = sadd.s32 1, %s489_s12   ;;  %s69_s16 = sadd.s32 1, %s485_s11 }
   0x5   : > { %s66_s17 = ssub.s32 %s489_s12, %s537_s15  ;;  %p79_p0 = scmp.ne.s32.totalorder %s485_s11, %s481_s10 }
   0x6   : > { %p67_p1 = scmp.eq.s32.totalorder %s66_s17, 0  ;;  %p80_p2 = scmp.eq.s32.totalorder %s533_s13, 3 }
   0x7   : > { %p85_p3 = scmp.ne.s32.totalorder %s481_s10, %s477_s9  ;;  %p86_p4 = scmp.eq.s32.totalorder %s344_s14, 3 }
   0x8   : > { %s548_s18 = scalar_select %p67_p1, %s485_s11, %s69_s16  }
   0x9   : > { %p550_p5 = por %p80_p2, %p79_p0  ;;  %p554_p6 = por %p86_p4, %p85_p3 }
   0xa   : > { %p347_p7 = scmp.ge.s32.totalorder %s489_s12, 1  ;;  %p116_p8 = scmp.lt.s32.totalorder %s489_s12, 5 }
   0xc   : > { %p117_p9 = pnand %p347_p7, %p116_p8 }
   0xd   : > { %s349_s21 = sshll.u32 (!%p117_p9), %s533_s13, 1  ;;  %s493_s30 = smov (!%p117_p9), 112  }
   0xe   : > { %120 = sbr.rel (%p117_p9) target bundleno = 352 (0x160), region = 28  ;;  %p139_p10 = scmp.lt.s32.totalorder (!%p117_p9), %s349_s21, 7 }
   0xf   : > { %s135_s3 = sand.u32 (!%p117_p9), 1, %s481_s10   ;;  %s366_s7 = sshll.u32 (!%p117_p9), %s533_s13, 9 }
  0x10   : > { %s348_s4 = sshll.u32 (!%p117_p9), %s135_s3, 5  ;;  %s580_s16 = scalar_lea.hbm (!%p117_p9), %s625_s2, %s366_s7 }
  0x11   : > { %s137_s5 = scalar_lea.vmem (!%p117_p9), [#allocation2], %s348_s4  ;;  %s583_s17 = scalar_lea.sflag (!%p117_p9), [#allocation3], %s135_s3 }
  0x12   : > { %s282_s6 = sshll.u32 (!%p117_p9), %s137_s5, 4  ;;  %s575_s6 = int_to_ptr.vmem [resolvable:$true] %s282_s6 }
  0x13   : > { %v427_v0 = vld [vmem:[%s624_s1] sm:$0xff]   ;;  %v491_v1 = vmov 0.0   ;;  %v428_v2 = vld [vmem:[%s624_s1 + $0x8] sm:$0xff]   ;;  %vm492_vm0 = vmmov 0   ;;  %s633_s21 = smov (!%p139_p10, %s349_s21), 7  ;;  %vm157_vm1 = vcmask 130048  }
  0x14   : > { %371 = vmatprep.subr.bf16.mxu0 %v491_v1  ;;  %377 = vmatprep.subr.bf16.mxu1 %v491_v1  ;;  %s350_s26 = sshll.u32 %s633_s21, 3  ;;  %vm202_vm2 = vcmask 64512   ;;  %s429_s13 = scalar_lea.vmem %s575_s6, 512 }
  0x15   : > { %372 = vmatpush3.bf16.msra.mxu0 %v427_v0  ;;  %373 = vmatprep.mubr.msk.bf16.mxu0 %vm492_vm0, %v491_v1  ;;  %s142_s29 = scalar_lea.vmem %s623_s0, %s350_s26  ;;  %p430_p11 = scmp.ne.s32.totalorder %s575_s6, %s429_s13 }
  0x16   : > { %378 = vmatpush3.bf16.msra.mxu1 %v428_v2  ;;  %379 = vmatprep.mubr.msk.bf16.mxu1 %vm492_vm0, %v491_v1  ;;  %v205_v3 = vld [vmem:[%s142_s29] sm:$0xff]  ;;  %v206_v4 = vld [vmem:[%s142_s29 + $0x8] sm:$0xff]  ;;  %s494_s21 = smov [#allocation2]  }
  0x17   : > { %v207_v5 = vpack.c.bf16 %v206_v4, %v205_v3  ;;  %p431_p12 = pnand %p430_p11, %p550_p5  ;;  %s433_s22 = sshll.u32 %s494_s21, 4  ;;  %s434_s22 = int_to_ptr.vmem [resolvable:$false] %s433_s22 }
  0x18   : > { %s435_s23 = scalar_lea.vmem %s434_s22, 1024  ;;  %p436_p0 = scmp.lt.s32.totalorder %s575_s6, %s434_s22 }
  0x19   : > { %212 = vrot.lane.b32.xlu0 %v207_v5, %s493_s30  ;;  %374 = vmatmul.mubr.msk.bf16.vlgmr.msra.gmra.mxu0 %vm157_vm1, %v207_v5  ;;  %p432_p13 = pneg %p431_p12  ;;  %p437_p1 = scmp.lt.s32.totalorder %s435_s23, %s429_s13 }
  0x1b   : > { %p438_p2 = por %p437_p1, %p436_p0 }
  0x1d   : > { %p439_p3 = pnand %p438_p2, %p432_p13 }
  0x8b   : > { %v213_v6 = vpop.permute.xlu0 %212 }
  0x8c   : > { %380 = vmatmul.mubr.msk.bf16.vlgmr.msra.gmra.mxu1 %vm157_vm1, %v213_v6 }
  0xd9   : > { %v195_v7 = vpop.f32.mrf.mxu0 }
  0xda   : > { %203 = vst.msk [vmem:[%s137_s5] sm:$0xff] %vm202_vm2, %v195_v7 }
  0xdb   : > { %v375_v8 = vpop.f32.mrf.mxu0 }
  0xdd   : > { %v198_v9 = vpop.f32.mrf.mxu0 }
  0xde   : > { %204 = vst.msk [vmem:[%s137_s5 + $0x10] sm:$0xff] %vm202_vm2, %v198_v9 }
  0xdf   : > { %v376_v10 = vpop.f32.mrf.mxu0 }
 0x14c   : > { %v257_v11 = vpop.f32.mrf.mxu1 }
 0x14d   : > { %357 = vst.msk [vmem:[%s137_s5 + $0x8] sm:$0xff] %vm202_vm2, %v257_v11 }
 0x14e   : > { %v381_v12 = vpop.f32.mrf.mxu1 }
 0x150   : > { %v260_v13 = vpop.f32.mrf.mxu1 }
 0x151   : > { %358 = vst.msk [vmem:[%s137_s5 + $0x18] sm:$0xff] %vm202_vm2, %v260_v13 }
 0x152   : > { %v382_v14 = vpop.f32.mrf.mxu1 }
 0x153   : > { %442 = shalt.err (!%p439_p3)
}
 0x154   : > { %s443_s24 = scalar_lea.hbm %s580_s16, 512  ;;  %s447_s27 = scalar_lea.hbm %s625_s2, 2048 }
 0x155   : > { %p444_p4 = scmp.ne.s32.totalorder %s580_s16, %s443_s24  ;;  %p448_p9 = scmp.lt.s32.totalorder %s580_s16, %s625_s2 }
 0x156   : > { %p449_p10 = scmp.lt.s32.totalorder %s447_s27, %s443_s24 }
 0x157   : > { %p445_p7 = pnand %p444_p4, %p550_p5 }
 0x158   : > { %p450_p11 = por %p449_p10, %p448_p9 }
 0x159   : > { %p446_p8 = pneg %p445_p7 }
 0x15b   : > { %p451_p12 = pnand %p450_p11, %p446_p8 }
 0x15d   : > { %454 = shalt.err (!%p451_p12)
}
 0x15e   : > { %s495_s30 = smov 128   ;;  %s496_s3 = smov 8  }
 0x15f   : > { %383 = dma.vmem_to_hbm [thread:$0]  (%p550_p5), %s575_s6, 512, %s580_s16, %s583_s17, %s495_s30, %s495_s30, %s496_s3  }
 0x160 PF: > { %p389_p13 = scmp.ge.s32.totalorder %s489_s12, 2  ;;  %s297_s4 = sand.u32 1, %s477_s9  }
 0x161   : > { %s298_s5 = scalar_lea.sflag [#allocation3], %s297_s4 }
 0x162   : > { %p386_p0 = pnand %p389_p13, %p554_p6 }
 0x164   : > { %p387_p1 = pneg %p386_p0 }
 0x166   : > { %472 = dma.done.wait (%p387_p1), %s298_s5, 512  }
 0x167   : > { %474 = vsyncadd (%p387_p1), %s298_s5, 4294966784  ;;  %p12_p2 = scmp.ge.s32.totalorder %s537_s15, 6   ;;  %s628_s9 = smov %s481_s10 }
 0x168   : > { %s629_s10 = smov %s485_s11  ;;  %s630_s11 = smov %s548_s18 }
 0x169   : > { %s631_s12 = smov %s537_s15  ;;  %14 = sbr.rel (!%p12_p2) target bundleno = 3 (0x3), region = 65 }
 0x16e   :  { %303 = vsyncpa [#allocation3], 1 }
 0x16f   :  { %305 = vsyncpa [#allocation3 + $0x1], 1 }

// kernel: tpu_custom_call.1
= control target key start
LH: loop header
LB: loop body
LE: loop exit
PB: predicated region body
PF: predicated region fallthrough
CT: control target
= control target key end

     0   :  { %7 = vsyncpa [#allocation3], 0  ;;  %s623_s0 = inlined_call_operand.vmem [shape: f32[64,32], index: 0, kind: input, shape index: {}]   ;;  %s624_s1 = inlined_call_operand.vmem [shape: bf16[2,16,8], index: 1, kind: input, shape index: {}]   ;;  %s625_s2 = inlined_call_operand.hbm [shape: f32[8,2,8,8], index: 2, kind: output, shape index: {}]  }
   0x1   :  { %9 = vsyncpa [#allocation3 + $0x1], 0  ;;  %s512_s9 = smov 0   ;;  %s514_s10 = smov 0  }
   0x2   :  { %s516_s11 = smov 0   ;;  %s518_s12 = smov 0  }
   0x3 LB: > { %s533_s13 = sadd.s32 4294967295, %s489_s12   ;;  %s344_s14 = sadd.s32 4294967294, %s489_s12   ;;  %s489_s12 = sphi %s518_s12, %s631_s12   ;;  %s485_s11 = sphi %s516_s11, %s630_s11   ;;  %s481_s10 = sphi %s514_s10, %s629_s10   ;;  %s477_s9 = sphi %s512_s9, %s628_s9  }
   0x4   : > { %s537_s15 = sadd.s32 1, %s489_s12   ;;  %s69_s16 = sadd.s32 1, %s485_s11 }
   0x5   : > { %s66_s17 = ssub.s32 %s489_s12, %s537_s15  ;;  %p79_p0 = scmp.ne.s32.totalorder %s485_s11, %s481_s10 }
   0x6   : > { %p67_p1 = scmp.eq.s32.totalorder %s66_s17, 0  ;;  %p80_p2 = scmp.eq.s32.totalorder %s533_s13, 3 }
   0x7   : > { %p85_p3 = scmp.ne.s32.totalorder %s481_s10, %s477_s9  ;;  %p86_p4 = scmp.eq.s32.totalorder %s344_s14, 3 }
   0x8   : > { %s548_s18 = scalar_select %p67_p1, %s485_s11, %s69_s16  }
   0x9   : > { %p550_p5 = por %p80_p2, %p79_p0  ;;  %p554_p6 = por %p86_p4, %p85_p3 }
   0xa   : > { %p347_p7 = scmp.ge.s32.totalorder %s489_s12, 1  ;;  %p116_p8 = scmp.lt.s32.totalorder %s489_s12, 5 }
   0xc   : > { %p117_p9 = pnand %p347_p7, %p116_p8 }
   0xd   : > { %s349_s21 = sshll.u32 (!%p117_p9), %s533_s13, 1  ;;  %s493_s30 = smov (!%p117_p9), 112  }
   0xe   : > { %120 = sbr.rel (%p117_p9) target bundleno = 352 (0x160), region = 28  ;;  %p139_p10 = scmp.lt.s32.totalorder (!%p117_p9), %s349_s21, 7 }
   0xf   : > { %s135_s3 = sand.u32 (!%p117_p9), 1, %s481_s10   ;;  %s366_s7 = sshll.u32 (!%p117_p9), %s533_s13, 9 }
  0x10   : > { %s348_s4 = sshll.u32 (!%p117_p9), %s135_s3, 5  ;;  %s580_s16 = scalar_lea.hbm (!%p117_p9), %s625_s2, %s366_s7 }
  0x11   : > { %s137_s5 = scalar_lea.vmem (!%p117_p9), [#allocation2], %s348_s4  ;;  %s583_s17 = scalar_lea.sflag (!%p117_p9), [#allocation3], %s135_s3 }
  0x12   : > { %s282_s6 = sshll.u32 (!%p117_p9), %s137_s5, 4  ;;  %s575_s6 = int_to_ptr.vmem [resolvable:$true] %s282_s6 }
  0x13   : > { %v427_v0 = vld [vmem:[%s624_s1] sm:$0xff]   ;;  %v491_v1 = vmov 0.0   ;;  %v428_v2 = vld [vmem:[%s624_s1 + $0x8] sm:$0xff]   ;;  %vm492_vm0 = vmmov 0   ;;  %s633_s21 = smov (!%p139_p10, %s349_s21), 7  ;;  %vm157_vm1 = vcmask 130048  }
  0x14   : > { %371 = vmatprep.subr.bf16.mxu0 %v491_v1  ;;  %377 = vmatprep.subr.bf16.mxu1 %v491_v1  ;;  %s350_s26 = sshll.u32 %s633_s21, 3  ;;  %vm202_vm2 = vcmask 64512   ;;  %s429_s13 = scalar_lea.vmem %s575_s6, 512 }
  0x15   : > { %372 = vmatpush3.bf16.msra.mxu0 %v427_v0  ;;  %373 = vmatprep.mubr.msk.bf16.mxu0 %vm492_vm0, %v491_v1  ;;  %s142_s29 = scalar_lea.vmem %s623_s0, %s350_s26  ;;  %p430_p11 = scmp.ne.s32.totalorder %s575_s6, %s429_s13 }
  0x16   : > { %378 = vmatpush3.bf16.msra.mxu1 %v428_v2  ;;  %379 = vmatprep.mubr.msk.bf16.mxu1 %vm492_vm0, %v491_v1  ;;  %v205_v3 = vld [vmem:[%s142_s29] sm:$0xff]  ;;  %v206_v4 = vld [vmem:[%s142_s29 + $0x8] sm:$0xff]  ;;  %s494_s21 = smov [#allocation2]  }
  0x17   : > { %v207_v5 = vpack.c.bf16 %v206_v4, %v205_v3  ;;  %p431_p12 = pnand %p430_p11, %p550_p5  ;;  %s433_s22 = sshll.u32 %s494_s21, 4  ;;  %s434_s22 = int_to_ptr.vmem [resolvable:$false] %s433_s22 }
  0x18   : > { %s435_s23 = scalar_lea.vmem %s434_s22, 1024  ;;  %p436_p0 = scmp.lt.s32.totalorder %s575_s6, %s434_s22 }
  0x19   : > { %212 = vrot.lane.b32.xlu0 %v207_v5, %s493_s30  ;;  %374 = vmatmul.mubr.msk.bf16.vlgmr.msra.gmra.mxu0 %vm157_vm1, %v207_v5  ;;  %p432_p13 = pneg %p431_p12  ;;  %p437_p1 = scmp.lt.s32.totalorder %s435_s23, %s429_s13 }
  0x1b   : > { %p438_p2 = por %p437_p1, %p436_p0 }
  0x1d   : > { %p439_p3 = pnand %p438_p2, %p432_p13 }
  0x8b   : > { %v213_v6 = vpop.permute.xlu0 %212 }
  0x8c   : > { %380 = vmatmul.mubr.msk.bf16.vlgmr.msra.gmra.mxu1 %vm157_vm1, %v213_v6 }
  0xd9   : > { %v195_v7 = vpop.f32.mrf.mxu0 }
  0xda   : > { %203 = vst.msk [vmem:[%s137_s5] sm:$0xff] %vm202_vm2, %v195_v7 }
  0xdb   : > { %v375_v8 = vpop.f32.mrf.mxu0 }
  0xdd   : > { %v198_v9 = vpop.f32.mrf.mxu0 }
  0xde   : > { %204 = vst.msk [vmem:[%s137_s5 + $0x10] sm:$0xff] %vm202_vm2, %v198_v9 }
  0xdf   : > { %v376_v10 = vpop.f32.mrf.mxu0 }
 0x14c   : > { %v257_v11 = vpop.f32.mrf.mxu1 }
 0x14d   : > { %357 = vst.msk [vmem:[%s137_s5 + $0x8] sm:$0xff] %vm202_vm2, %v257_v11 }
 0x14e   : > { %v381_v12 = vpop.f32.mrf.mxu1 }
 0x150   : > { %v260_v13 = vpop.f32.mrf.mxu1 }
 0x151   : > { %358 = vst.msk [vmem:[%s137_s5 + $0x18] sm:$0xff] %vm202_vm2, %v260_v13 }
 0x152   : > { %v382_v14 = vpop.f32.mrf.mxu1 }
 0x153   : > { %442 = shalt.err (!%p439_p3)
}
 0x154   : > { %s443_s24 = scalar_lea.hbm %s580_s16, 512  ;;  %s447_s27 = scalar_lea.hbm %s625_s2, 2048 }
 0x155   : > { %p444_p4 = scmp.ne.s32.totalorder %s580_s16, %s443_s24  ;;  %p448_p9 = scmp.lt.s32.totalorder %s580_s16, %s625_s2 }
 0x156   : > { %p449_p10 = scmp.lt.s32.totalorder %s447_s27, %s443_s24 }
 0x157   : > { %p445_p7 = pnand %p444_p4, %p550_p5 }
 0x158   : > { %p450_p11 = por %p449_p10, %p448_p9 }
 0x159   : > { %p446_p8 = pneg %p445_p7 }
 0x15b   : > { %p451_p12 = pnand %p450_p11, %p446_p8 }
 0x15d   : > { %454 = shalt.err (!%p451_p12)
}
 0x15e   : > { %s495_s30 = smov 128   ;;  %s496_s3 = smov 8  }
 0x15f   : > { %383 = dma.vmem_to_hbm [thread:$0]  (%p550_p5), %s575_s6, 512, %s580_s16, %s583_s17, %s495_s30, %s495_s30, %s496_s3  }
 0x160 PF: > { %p389_p13 = scmp.ge.s32.totalorder %s489_s12, 2  ;;  %s297_s4 = sand.u32 1, %s477_s9  }
 0x161   : > { %s298_s5 = scalar_lea.sflag [#allocation3], %s297_s4 }
 0x162   : > { %p386_p0 = pnand %p389_p13, %p554_p6 }
 0x164   : > { %p387_p1 = pneg %p386_p0 }
 0x166   : > { %472 = dma.done.wait (%p387_p1), %s298_s5, 512  }
 0x167   : > { %474 = vsyncadd (%p387_p1), %s298_s5, 4294966784  ;;  %p12_p2 = scmp.ge.s32.totalorder %s537_s15, 6   ;;  %s628_s9 = smov %s481_s10 }
 0x168   : > { %s629_s10 = smov %s485_s11  ;;  %s630_s11 = smov %s548_s18 }
 0x169   : > { %s631_s12 = smov %s537_s15  ;;  %14 = sbr.rel (!%p12_p2) target bundleno = 3 (0x3), region = 65 }
 0x16e   :  { %303 = vsyncpa [#allocation3], 1 }
 0x16f   :  { %305 = vsyncpa [#allocation3 + $0x1], 1 }

</bundles_post_ra>
